<compile_context>
chip_gen: v7x
topology: tpu7x:2x2x1
jax: 0.10.0
libtpu: 0.0.40
codegen_flags: <defaults>
</compile_context>

<pallas_src>
import math

import jax
import jax.numpy as jnp
from jax.experimental import pallas as pl
from jax.experimental.pallas import tpu as pltpu


# ---------------------------------------------------------------------------
# Kernel: 3 matmuls + LeakyReLU + LeakyReLU + tanh, fully fused.
# ---------------------------------------------------------------------------
def _actor_kernel(x_ref, w1_ref, b1_ref, w2_ref, b2_ref, w3_ref, b3_ref, out_ref):
    # Cast the input to the MXU operand dtype in-kernel (no host-side pass).
    x = x_ref[...].astype(w1_ref.dtype)

    # Layer 1: MXU matmul (f32 accumulate) + LeakyReLU(0.01) in f32 on the VPU.
    h1 = jnp.dot(x, w1_ref[...], preferred_element_type=jnp.float32) + b1_ref[...]
    h1 = jnp.maximum(h1, 0.01 * h1)

    # Layer 2.
    h2 = jnp.dot(h1.astype(w2_ref.dtype), w2_ref[...],
                 preferred_element_type=jnp.float32) + b2_ref[...]
    h2 = jnp.maximum(h2, 0.01 * h2)

    # Layer 3 + tanh (EUP).  Output block is the true action width.
    p = jnp.dot(h2.astype(w3_ref.dtype), w3_ref[...],
                preferred_element_type=jnp.float32) + b3_ref[...]
    out_ref[...] = jnp.tanh(p)


# ---------------------------------------------------------------------------
# Parameter preparation
# ---------------------------------------------------------------------------
def _round_up(x, m):
    return ((x + m - 1) // m) * m


def _pad2d(a, rows, cols):
    r, c = a.shape
    return jnp.pad(a, ((0, rows - r), (0, cols - c)))


def init_raw_params(key, num_inputs, num_units_1, num_units_2, action_size):
    """PyTorch-like Linear init (weights scaled by gains from reset_parameters).
    Weights stored as (in, out)."""
    gain_lrelu = math.sqrt(2.0 / (1.0 + 0.01 ** 2))   # calculate_gain('leaky_relu')
    gain_tanh = 5.0 / 3.0                             # calculate_gain('tanh')

    def linear(k, fan_in, fan_out, gain):
        kw, kb = jax.random.split(k)
        bound = 1.0 / math.sqrt(fan_in)
        w = jax.random.uniform(kw, (fan_in, fan_out), jnp.float32, -bound, bound) * gain
        b = jax.random.uniform(kb, (fan_out,), jnp.float32, -bound, bound)
        return w, b

    k1, k2, k3 = jax.random.split(key, 3)
    w1, b1 = linear(k1, num_inputs, num_units_1, gain_lrelu)
    w2, b2 = linear(k2, num_units_1, num_units_2, gain_lrelu)
    w3, b3 = linear(k3, num_units_2, action_size, gain_tanh)
    return {"w1": w1, "b1": b1, "w2": w2, "b2": b2, "w3": w3, "b3": b3}


def prepare_params(raw, compute_dtype=jnp.bfloat16):
    """Zero-pad the hidden dims to 128 lanes (lane-dense intermediates); the
    final layer keeps its TRUE action width so the kernel never writes padded
    output columns.  Weights cast to the matmul compute dtype, biases stay f32."""
    w1, b1, w2, b2, w3, b3 = (raw[k] for k in ("w1", "b1", "w2", "b2", "w3", "b3"))
    din, h1 = w1.shape
    _, h2 = w2.shape
    _, a = w3.shape
    H1, H2 = _round_up(h1, 128), _round_up(h2, 128)
    return {
        "w1": _pad2d(w1, din, H1).astype(compute_dtype),
        "b1": _pad2d(b1.reshape(1, -1), 1, H1).astype(jnp.float32),
        "w2": _pad2d(w2, H1, H2).astype(compute_dtype),
        "b2": _pad2d(b2.reshape(1, -1), 1, H2).astype(jnp.float32),
        "w3": _pad2d(w3, H2, a).astype(compute_dtype),   # last dim unpadded
        "b3": b3.reshape(1, -1).astype(jnp.float32),
    }


# ---------------------------------------------------------------------------
# Batch tiling: multiple of 8 rows, >=2 grid steps when possible (v7x dual
# TensorCore), bounded padding waste.
# ---------------------------------------------------------------------------
def _choose_tiling(batch, block_b):
    b8 = _round_up(batch, 8)
    if b8 <= 8:
        return 8, 8
    n_target = max(2, pl.cdiv(b8, block_b))
    tb = _round_up(pl.cdiv(b8, n_target), 8)
    n_blocks = pl.cdiv(b8, tb)
    return tb, n_blocks * tb


# ---------------------------------------------------------------------------
# Wrapper
# ---------------------------------------------------------------------------
def actor_forward(x, params, *, block_b=1024):
    """x: (B, num_inputs) f32 -> policy: (B, action_size) f32."""
    B, Din = x.shape
    A = params["w3"].shape[1]                # true action_size

    TB, Bp = _choose_tiling(B, block_b)
    if Bp != B:
        x = jnp.pad(x, ((0, Bp - B), (0, 0)))

    # Constant index_map => weights/biases stay resident in VMEM across steps.
    resident = lambda arr: pl.BlockSpec(arr.shape, lambda i: (0, 0))

    out = pl.pallas_call(
        _actor_kernel,
        out_shape=jax.ShapeDtypeStruct((Bp, A), jnp.float32),
        grid=(Bp // TB,),
        in_specs=[
            pl.BlockSpec((TB, Din), lambda i: (i, 0)),
            resident(params["w1"]), resident(params["b1"]),
            resident(params["w2"]), resident(params["b2"]),
            resident(params["w3"]), resident(params["b3"]),
        ],
        out_specs=pl.BlockSpec((TB, A), lambda i: (i, 0)),
        compiler_params=pltpu.CompilerParams(
            dimension_semantics=("parallel",),
            vmem_limit_bytes=32 * 1024 * 1024,
        ),
    )(
        x,
        params["w1"], params["b1"],
        params["w2"], params["b2"],
        params["w3"], params["b3"],
    )
    return out if Bp == B else out[:B]


# ---------------------------------------------------------------------------
# Pure-JAX reference on the unpadded f32 weights
# ---------------------------------------------------------------------------
def reference_forward(x, raw):
    h1 = x @ raw["w1"] + raw["b1"]
    h1 = jnp.where(h1 > 0, h1, 0.01 * h1)
    h2 = h1 @ raw["w2"] + raw["b2"]
    h2 = jnp.where(h2 > 0, h2, 0.01 * h2)
    return jnp.tanh(h2 @ raw["w3"] + raw["b3"])


if __name__ == "__main__":
    key = jax.random.PRNGKey(0)
    k_x, k_x2, k_p = jax.random.split(key, 3)

    # Small shapes consistent with the module: args.num_units_1 = num_units_2 = 32.
    batch, num_inputs, n1, n2, action_size = 8, 16, 32, 32, 8

    x = jax.random.normal(k_x, (batch, num_inputs), jnp.float32)
    raw = init_raw_params(k_p, num_inputs, n1, n2, action_size)
    ref = reference_forward(x, raw)

    # Default bf16 matmul-operand path (MXU-native on v5e/v6e/v7x).
    params_bf16 = prepare_params(raw)                      # default bf16
    policy_bf16 = jax.block_until_ready(actor_forward(x, params_bf16))
    assert policy_bf16.shape == (batch, action_size)
    assert jnp.allclose(policy_bf16, ref, atol=3e-2, rtol=3e-2)

    # f32 path (tight tolerance).
    params_f32 = prepare_params(raw, compute_dtype=jnp.float32)
    policy_f32 = jax.block_until_ready(actor_forward(x, params_f32))
    assert policy_f32.shape == (batch, action_size)
    assert jnp.allclose(policy_f32, ref, atol=1e-4, rtol=1e-4)

    # Uneven batch: exercises row padding and a multi-step (>=2) parallel grid.
    batch2 = 20
    x2 = jax.random.normal(k_x2, (batch2, num_inputs), jnp.float32)
    ref2 = reference_forward(x2, raw)
    policy2 = jax.block_until_ready(actor_forward(x2, params_f32))
    assert policy2.shape == (batch2, action_size)
    assert jnp.allclose(policy2, ref2, atol=1e-4, rtol=1e-4)

    print("KERNEL_OK")
</pallas_src>

<mosaic_0001>
module attributes {stable_mosaic.version = 11 : i64} {
  func.func @_actor_kernel(%arg0: i32, %arg1: memref<8x16xf32, #tpu.memory_space<vmem>>, %arg2: memref<16x128xbf16, #tpu.memory_space<vmem>>, %arg3: memref<1x128xf32, #tpu.memory_space<vmem>>, %arg4: memref<128x128xbf16, #tpu.memory_space<vmem>>, %arg5: memref<1x128xf32, #tpu.memory_space<vmem>>, %arg6: memref<128x8xbf16, #tpu.memory_space<vmem>>, %arg7: memref<1x8xf32, #tpu.memory_space<vmem>>, %arg8: memref<8x8xf32, #tpu.memory_space<vmem>>) attributes {dimension_semantics = [#tpu.dimension_semantics<parallel>], iteration_bounds = array<i64: 1>, scalar_prefetch = 0 : i64, scratch_operands = 0 : i64, tpu.core_type = #tpu.core_type<tc>, window_params = [{transform_indices = @transform_0, window_bounds = array<i64: 8, 16>}, {pipeline_mode = #tpu.pipeline_mode<synchronous>, transform_indices = @transform_1, window_bounds = array<i64: 16, 128>}, {pipeline_mode = #tpu.pipeline_mode<synchronous>, transform_indices = @transform_2, window_bounds = array<i64: 1, 128>}, {pipeline_mode = #tpu.pipeline_mode<synchronous>, transform_indices = @transform_3, window_bounds = array<i64: 128, 128>}, {pipeline_mode = #tpu.pipeline_mode<synchronous>, transform_indices = @transform_4, window_bounds = array<i64: 1, 128>}, {pipeline_mode = #tpu.pipeline_mode<synchronous>, transform_indices = @transform_5, window_bounds = array<i64: 128, 8>}, {pipeline_mode = #tpu.pipeline_mode<synchronous>, transform_indices = @transform_6, window_bounds = array<i64: 1, 8>}, {transform_indices = @transform_7, window_bounds = array<i64: 8, 8>}]} {
    %c0 = arith.constant 0 : index
    %c0_0 = arith.constant 0 : index
    %0 = vector.load %arg1[%c0, %c0_0] : memref<8x16xf32, #tpu.memory_space<vmem>>, vector<8x16xf32>
    %1 = arith.truncf %0 : vector<8x16xf32> to vector<8x16xbf16>
    %c0_1 = arith.constant 0 : index
    %c0_2 = arith.constant 0 : index
    %2 = vector.load %arg2[%c0_1, %c0_2] : memref<16x128xbf16, #tpu.memory_space<vmem>>, vector<16x128xbf16>
    %cst = arith.constant dense<0.000000e+00> : vector<8x128xf32>
    %3 = tpu.matmul %1, %2, %cst {dimension_numbers = #tpu.dot_dimension_numbers<[1], [0], [0], [1], [0, 0, 1, 1], [], []>} : vector<8x16xbf16>, vector<16x128xbf16>, vector<8x128xf32> -> vector<8x128xf32>
    %c0_3 = arith.constant 0 : index
    %c0_4 = arith.constant 0 : index
    %4 = vector.load %arg3[%c0_3, %c0_4] : memref<1x128xf32, #tpu.memory_space<vmem>>, vector<1x128xf32>
    %5 = vector.broadcast %4 : vector<1x128xf32> to vector<8x128xf32>
    %6 = arith.addf %3, %5 : vector<8x128xf32>
    %cst_5 = arith.constant 0.00999999977 : f32
    %7 = vector.broadcast %cst_5 : f32 to vector<8x128xf32>
    %8 = arith.mulf %7, %6 : vector<8x128xf32>
    %9 = arith.maximumf %6, %8 : vector<8x128xf32>
    %10 = arith.truncf %9 : vector<8x128xf32> to vector<8x128xbf16>
    %c0_6 = arith.constant 0 : index
    %c0_7 = arith.constant 0 : index
    %11 = vector.load %arg4[%c0_6, %c0_7] : memref<128x128xbf16, #tpu.memory_space<vmem>>, vector<128x128xbf16>
    %cst_8 = arith.constant dense<0.000000e+00> : vector<8x128xf32>
    %12 = tpu.matmul %10, %11, %cst_8 {dimension_numbers = #tpu.dot_dimension_numbers<[1], [0], [0], [1], [0, 0, 1, 1], [], []>} : vector<8x128xbf16>, vector<128x128xbf16>, vector<8x128xf32> -> vector<8x128xf32>
    %c0_9 = arith.constant 0 : index
    %c0_10 = arith.constant 0 : index
    %13 = vector.load %arg5[%c0_9, %c0_10] : memref<1x128xf32, #tpu.memory_space<vmem>>, vector<1x128xf32>
    %14 = vector.broadcast %13 : vector<1x128xf32> to vector<8x128xf32>
    %15 = arith.addf %12, %14 : vector<8x128xf32>
    %cst_11 = arith.constant 0.00999999977 : f32
    %16 = vector.broadcast %cst_11 : f32 to vector<8x128xf32>
    %17 = arith.mulf %16, %15 : vector<8x128xf32>
    %18 = arith.maximumf %15, %17 : vector<8x128xf32>
    %19 = arith.truncf %18 : vector<8x128xf32> to vector<8x128xbf16>
    %c0_12 = arith.constant 0 : index
    %c0_13 = arith.constant 0 : index
    %20 = vector.load %arg6[%c0_12, %c0_13] : memref<128x8xbf16, #tpu.memory_space<vmem>>, vector<128x8xbf16>
    %cst_14 = arith.constant dense<0.000000e+00> : vector<8x8xf32>
    %21 = tpu.matmul %19, %20, %cst_14 {dimension_numbers = #tpu.dot_dimension_numbers<[1], [0], [0], [1], [0, 0, 1, 1], [], []>} : vector<8x128xbf16>, vector<128x8xbf16>, vector<8x8xf32> -> vector<8x8xf32>
    %c0_15 = arith.constant 0 : index
    %c0_16 = arith.constant 0 : index
    %22 = vector.load %arg7[%c0_15, %c0_16] : memref<1x8xf32, #tpu.memory_space<vmem>>, vector<1x8xf32>
    %23 = vector.broadcast %22 : vector<1x8xf32> to vector<8x8xf32>
    %24 = arith.addf %21, %23 : vector<8x8xf32>
    %25 = math.tanh %24 : vector<8x8xf32>
    %c0_17 = arith.constant 0 : index
    %c0_18 = arith.constant 0 : index
    %26 = vector.load %arg8[%c0_17, %c0_18] : memref<8x8xf32, #tpu.memory_space<vmem>>, vector<8x8xf32>
    tpu.vector_store %arg8[%c0_17, %c0_18], %25 {strides = array<i32>} : memref<8x8xf32, #tpu.memory_space<vmem>>, vector<8x8xf32>,
    return
  }
  func.func @transform_0(%arg0: i32) -> (i32, i32) {
    %c0_i32 = arith.constant 0 : i32
    %c0_i32_0 = arith.constant 0 : i32
    return %arg0, %c0_i32 : i32, i32
  }
  func.func @transform_1(%arg0: i32) -> (i32, i32) {
    %c0_i32 = arith.constant 0 : i32
    %c0_i32_0 = arith.constant 0 : i32
    %c0_i32_1 = arith.constant 0 : i32
    return %c0_i32, %c0_i32_0 : i32, i32
  }
  func.func @transform_2(%arg0: i32) -> (i32, i32) {
    %c0_i32 = arith.constant 0 : i32
    %c0_i32_0 = arith.constant 0 : i32
    %c0_i32_1 = arith.constant 0 : i32
    return %c0_i32, %c0_i32_0 : i32, i32
  }
  func.func @transform_3(%arg0: i32) -> (i32, i32) {
    %c0_i32 = arith.constant 0 : i32
    %c0_i32_0 = arith.constant 0 : i32
    %c0_i32_1 = arith.constant 0 : i32
    return %c0_i32, %c0_i32_0 : i32, i32
  }
  func.func @transform_4(%arg0: i32) -> (i32, i32) {
    %c0_i32 = arith.constant 0 : i32
    %c0_i32_0 = arith.constant 0 : i32
    %c0_i32_1 = arith.constant 0 : i32
    return %c0_i32, %c0_i32_0 : i32, i32
  }
  func.func @transform_5(%arg0: i32) -> (i32, i32) {
    %c0_i32 = arith.constant 0 : i32
    %c0_i32_0 = arith.constant 0 : i32
    %c0_i32_1 = arith.constant 0 : i32
    return %c0_i32, %c0_i32_0 : i32, i32
  }
  func.func @transform_6(%arg0: i32) -> (i32, i32) {
    %c0_i32 = arith.constant 0 : i32
    %c0_i32_0 = arith.constant 0 : i32
    %c0_i32_1 = arith.constant 0 : i32
    return %c0_i32, %c0_i32_0 : i32, i32
  }
  func.func @transform_7(%arg0: i32) -> (i32, i32) {
    %c0_i32 = arith.constant 0 : i32
    %c0_i32_0 = arith.constant 0 : i32
    return %arg0, %c0_i32 : i32, i32
  }
}

</mosaic_0001>

<bundles_post_ra>
// kernel: tpu_custom_call.1
= control target key start
LH: loop header
LB: loop body
LE: loop exit
PB: predicated region body
PF: predicated region fallthrough
CT: control target
= control target key end

     0   :  { %12 = vsyncpa [#allocation3], 0  ;;  %s659_s0 = inlined_call_operand.vmem [shape: f32[8,16], index: 0, kind: input, shape index: {}]   ;;  %s660_s1 = inlined_call_operand.hbm [shape: bf16[16,128], index: 1, kind: input, shape index: {}]   ;;  %s661_s2 = inlined_call_operand.vmem [shape: f32[1,128], index: 2, kind: input, shape index: {}]   ;;  %s662_s3 = inlined_call_operand.vmem [shape: bf16[128,128], index: 3, kind: input, shape index: {}]   ;;  %s663_s4 = inlined_call_operand.vmem [shape: f32[1,128], index: 4, kind: input, shape index: {}]   ;;  %s664_s5 = inlined_call_operand.vmem [shape: bf16[128,8], index: 5, kind: input, shape index: {}]   ;;  %s665_s6 = inlined_call_operand.vmem [shape: f32[1,8], index: 6, kind: input, shape index: {}]   ;;  %s666_s7 = inlined_call_operand.hbm [shape: f32[8,8], index: 7, kind: output, shape index: {}]  }
   0x1   :  { %13 = vsyncpa [#allocation4], 0  ;;  %s509_s24 = smov [#allocation2]   ;;  %s461_s28 = scalar_lea.hbm %s660_s1, 128 }
   0x2   :  { %s21_s25 = sshll.u32 %s509_s24, 4  ;;  %p462_p0 = scmp.ne.s32.totalorder %s660_s1, %s461_s28  ;;  %s22_s25 = int_to_ptr.vmem [resolvable:$true] %s21_s25 }
   0x3   :  { %p465_p1 = scmp.lt.u32.totalorder %s461_s28, %s660_s1 }
   0x5   :  { %p467_p2 = pnand %p465_p1, %p462_p0 }
   0x7   :  { %470 = shalt.err (!%p467_p2)
}
   0x8   :  { %s471_s10 = scalar_lea.vmem %s22_s25, 128  ;;  %p476_p4 = scmp.lt.s32.totalorder %s22_s25, %s22_s25 }
   0x9   :  { %p472_p3 = scmp.ne.s32.totalorder %s22_s25, %s471_s10  ;;  %p477_p5 = scmp.lt.s32.totalorder %s471_s10, %s471_s10 }
   0xb   :  { %p478_p6 = por %p477_p5, %p476_p4 }
   0xd   :  { %p479_p7 = pnand %p478_p6, %p472_p3 }
   0xf   :  { %482 = shalt.err (!%p479_p7)
}
  0x10   :  { %s510_s11 = smov 64   ;;  %s511_s12 = smov 4  }
  0x11   :  { %27 = dma.hbm_to_vmem [thread:$0]  %s660_s1, 128, %s22_s25, [#allocation3], %s510_s11, %s510_s11, %s511_s12  }
  0x12   :  { %505 = dma.done.wait [#allocation3], 128  }
  0x13   :  { %506 = vsyncadd [#allocation3], 4294967168  ;;  %v512_v0 = vmov 0.0   ;;  %vm513_vm0 = vmmov 0   ;;  %v442_v1 = vld [vmem:[#allocation2] sm:$0xff]   ;;  %vm59_vm1 = vcmask 130048  }
  0x14   :  { %390 = vmatprep.subr.bf16.mxu0 %v512_v0  ;;  %392 = vmatprep.mubr.msk.bf16.mxu0 %vm513_vm0, %v512_v0  ;;  %v42_v2 = vld [vmem:[%s659_s0] sm:$0xff]  ;;  %v444_v5 = vld [vmem:[%s662_s3 + $0x8] sm:$0xff]   ;;  %v445_v6 = vld [vmem:[%s662_s3 + $0x10] sm:$0xff]   ;;  %vm332_vm2 = vcmask 64512  }
  0x15   :  { %396 = vmatprep.subr.bf16.mxu1 %v512_v0  ;;  %412 = vmatprep.mubr.msk.bf16.mxu1 %vm513_vm0, %v512_v0  ;;  %v43_v3 = vpack.c.bf16 %v42_v2, %v42_v2  ;;  %v443_v4 = vld [vmem:[%s662_s3] sm:$0xff]   ;;  %v446_v7 = vld [vmem:[%s662_s3 + $0x18] sm:$0xff]   ;;  %v448_v9 = vld [vmem:[%s662_s3 + $0x28] sm:$0xff]  }
  0x16   :  { %391 = vmatpush3.bf16.msra.mxu0 %v442_v1  ;;  %397 = vmatpush3.bf16.msra.mxu1 %v443_v4  ;;  %v447_v8 = vld [vmem:[%s662_s3 + $0x20] sm:$0xff]   ;;  %v449_v10 = vld [vmem:[%s662_s3 + $0x30] sm:$0xff]   ;;  %v450_v11 = vld [vmem:[%s662_s3 + $0x38] sm:$0xff]  }
  0x17   :  { %416 = vmatprep.subr.bf16.mxu0 %v512_v0  ;;  %398 = vmatprep.subr.bf16.mxu1 %v512_v0  ;;  %v451_v12 = vld [vmem:[%s664_s5] sm:$0xff]   ;;  %v452_v13 = vld [vmem:[%s664_s5 + $0x8] sm:$0xff]   ;;  %v453_v14 = vld [vmem:[%s664_s5 + $0x10] sm:$0xff]  }
  0x18   :  { %v454_v15 = vld [vmem:[%s664_s5 + $0x18] sm:$0xff]   ;;  %v455_v16 = vld [vmem:[%s664_s5 + $0x20] sm:$0xff]   ;;  %v456_v17 = vld [vmem:[%s664_s5 + $0x28] sm:$0xff]  }
  0x19   :  { %393 = vmatmul.mubr.msk.bf16.vlgmr.msra.gmra.mrb[0].mxu0 %vm59_vm1, %v43_v3  ;;  %v349_v18 = vld [vmem:[%s661_s2] ss:$0 sm:$0xff]  ;;  %v457_v27 = vld [vmem:[%s664_s5 + $0x30] sm:$0xff]   ;;  %v458_v28 = vld [vmem:[%s664_s5 + $0x38] sm:$0xff]  }
  0x1a   :  { %432 = vmatprep.mubr.msk.bf16.mxu0 %vm513_vm0, %v512_v0  ;;  %399 = vmatpush3.bf16.msra.mxu1 %v444_v5  ;;  %v352_v29 = vld [vmem:[%s663_s4] ss:$0 sm:$0xff]  ;;  %s514_s4 = smov [#allocation5]  }
  0x1b   :  { %400 = vmatprep.subr.bf16.mxu1 %v512_v0  ;;  %417 = vmatpush3.bf16.msra.mxu0 %v451_v12  ;;  %v361_v38 = vld [vmem:[%s665_s6] ss:$0 sm:$0xff]  ;;  %s340_s5 = sshll.u32 %s514_s4, 4  ;;  %s341_s5 = int_to_ptr.vmem [resolvable:$true] %s340_s5 }
  0x1c   :  { %418 = vmatprep.subr.bf16.mxu0 %v512_v0  ;;  %s483_s26 = scalar_lea.vmem %s341_s5, 128  ;;  %p488_p9 = scmp.lt.s32.totalorder %s341_s5, %s341_s5 }
  0x1d   :  { %p484_p8 = scmp.ne.s32.totalorder %s341_s5, %s483_s26  ;;  %p489_p10 = scmp.lt.s32.totalorder %s483_s26, %s483_s26 }
  0x1e   :  { %401 = vmatpush3.bf16.msra.mxu1 %v445_v6 }
  0x1f   :  { %402 = vmatprep.subr.bf16.mxu1 %v512_v0  ;;  %419 = vmatpush3.bf16.msra.mxu0 %v452_v13  ;;  %p490_p11 = por %p489_p10, %p488_p9 }
  0x20   :  { %420 = vmatprep.subr.bf16.mxu0 %v512_v0 }
  0x21   :  { %p491_p12 = pnand %p490_p11, %p484_p8 }
  0x22   :  { %403 = vmatpush3.bf16.msra.mxu1 %v446_v7 }
  0x23   :  { %404 = vmatprep.subr.bf16.mxu1 %v512_v0  ;;  %421 = vmatpush3.bf16.msra.mxu0 %v453_v14 }
  0x24   :  { %422 = vmatprep.subr.bf16.mxu0 %v512_v0 }
  0x26   :  { %405 = vmatpush3.bf16.msra.mxu1 %v447_v8 }
  0x27   :  { %406 = vmatprep.subr.bf16.mxu1 %v512_v0  ;;  %423 = vmatpush3.bf16.msra.mxu0 %v454_v15 }
  0x28   :  { %424 = vmatprep.subr.bf16.mxu0 %v512_v0 }
  0x2a   :  { %407 = vmatpush3.bf16.msra.mxu1 %v448_v9 }
  0x2b   :  { %408 = vmatprep.subr.bf16.mxu1 %v512_v0  ;;  %425 = vmatpush3.bf16.msra.mxu0 %v455_v16 }
  0x2c   :  { %426 = vmatprep.subr.bf16.mxu0 %v512_v0 }
  0x2e   :  { %409 = vmatpush3.bf16.msra.mxu1 %v449_v10 }
  0x2f   :  { %410 = vmatprep.subr.bf16.mxu1 %v512_v0  ;;  %427 = vmatpush3.bf16.msra.mxu0 %v456_v17 }
  0x30   :  { %428 = vmatprep.subr.bf16.mxu0 %v512_v0 }
  0x32   :  { %411 = vmatpush3.bf16.msra.mxu1 %v450_v11 }
  0x33   :  { %429 = vmatpush3.bf16.msra.mxu0 %v457_v27 }
  0x34   :  { %430 = vmatprep.subr.bf16.mxu0 %v512_v0 }
  0x37   :  { %431 = vmatpush3.bf16.msra.mxu0 %v458_v28 }
  0xec   :  { %v97_v19 = vpop.f32.mrb[0].mxu0 }
  0xed   :  { %v98_v20 = vadd.f32 %v349_v18, %v97_v19  ;;  %v394_v21 = vpop.f32.mrb[1].mxu0 }
  0xee   :  { %v100_v22 = vpop.f32.mrb[2].mxu0 }
  0xef   :  { %v103_v23 = vmul.f32 0.01, %v98_v20  ;;  %v395_v24 = vpop.f32.mrb[3].mxu0 }
  0xf1   :  { %v104_v25 = vmax.f32 %v98_v20, %v103_v23 }
  0xf3   :  { %v105_v26 = vpack.c.bf16 %v104_v25, %v104_v25 }
  0xf5   :  { %413 = vmatmul.mubr.bf16.vlgmr.msra.gmra.mrb[0].mxu1 %v105_v26 }
 0x1c8   :  { %v211_v30 = vpop.f32.mrb[0].mxu1 }
 0x1c9   :  { %v212_v31 = vadd.f32 %v352_v29, %v211_v30  ;;  %v414_v32 = vpop.f32.mrb[1].mxu1 }
 0x1ca   :  { %v214_v33 = vpop.f32.mrb[2].mxu1 }
 0x1cb   :  { %v217_v34 = vmul.f32 0.01, %v212_v31  ;;  %v415_v35 = vpop.f32.mrb[3].mxu1 }
 0x1cd   :  { %v218_v36 = vmax.f32 %v212_v31, %v217_v34 }
 0x1cf   :  { %v219_v37 = vpack.c.bf16 %v218_v36, %v218_v36 }
 0x1d1   :  { %433 = vmatmul.mubr.bf16.vlgmr.msra.gmra.mrb[4].mxu0 %v219_v37 }
 0x2a4   :  { %v325_v39 = vpop.f32.mrb[4].mxu0 }
 0x2a5   :  { %v326_v40 = vadd.f32 %v361_v38, %v325_v39  ;;  %v434_v41 = vpop.f32.mrb[5].mxu0 }
 0x2a6   :  { %v328_v42 = vpop.f32.mrb[6].mxu0 }
 0x2a7   :  { %459 = vtanh.f32 %v326_v40  ;;  %v435_v43 = vpop.f32.mrb[7].mxu0 }
 0x2b1   :  { %v460_v44 = vpop.eup %459 }
 0x2b2   :  { %333 = vst.msk [vmem:[#allocation5] sm:$0xff] %vm332_vm2, %v460_v44 }
 0x2b3   :  { %494 = shalt.err (!%p491_p12)
}
 0x2b4   :  { %s495_s28 = scalar_lea.hbm %s666_s7, 128 }
 0x2b5   :  { %p496_p13 = scmp.ne.s32.totalorder %s666_s7, %s495_s28  ;;  %p499_p0 = scmp.lt.u32.totalorder %s495_s28, %s666_s7 }
 0x2b7   :  { %p501_p1 = pnand %p499_p0, %p496_p13 }
 0x2b9   :  { %504 = shalt.err (!%p501_p1)
}
 0x2ba   :  { %343 = dma.vmem_to_hbm [thread:$0]  %s341_s5, 128, %s666_s7, [#allocation4]  }
 0x2bb   :  { %507 = dma.done.wait [#allocation4], 128  }
 0x2bc   :  { %508 = vsyncadd [#allocation4], 4294967168 }
 0x2bd   :  { %347 = vsyncpa [#allocation3], 1 }
 0x2be   :  { %348 = vsyncpa [#allocation4], 1 }

</bundles_post_ra>
